<compile_context>
chip_gen: v7x
topology: tpu7x:2x2x1
jax: 0.10.0
libtpu: 0.0.40
codegen_flags: <defaults>
</compile_context>

<pallas_src>
import jax
import jax.numpy as jnp
from jax.experimental import pallas as pl
from jax.experimental.pallas import tpu as pltpu

IN_FEATURES = 28 * 28   # 784
HIDDEN = 20
OUT_FEATURES = 10
HIDDEN_PAD = 128        # pad hidden width to one full lane width
DEFAULT_TB = 2048       # batch tile (rows); sweep 1024/2048/4096 per generation


def mlp_kernel(x_ref, w1_ref, b1_ref, w2_ref, b2_ref, o_ref):
    # x_ref : [TB, 784]  f32/bf16   w1_ref: [784, 128] bf16   b1_ref: [1, 128] f32
    # w2_ref: [128, 10]  bf16       b2_ref: [1, 10]    f32    o_ref : [TB, 10] f32
    x = x_ref[...].astype(jnp.bfloat16)                      # no-op if x already bf16
    h = jnp.dot(x, w1_ref[...], preferred_element_type=jnp.float32)
    h = jnp.maximum(h + b1_ref[...], 0.0)                    # bias + ReLU in f32 (VPU)
    out = jnp.dot(h.astype(jnp.bfloat16), w2_ref[...],
                  preferred_element_type=jnp.float32) + b2_ref[...]
    o_ref[...] = out.astype(o_ref.dtype)


def prepare_params(w1, b1, w2, b2):
    """One-time parameter preprocessing (hoisted out of the per-call path).
    PyTorch nn.Linear layout in: w1 [20,784], b1 [20], w2 [10,20], b2 [10]."""
    w1t = jnp.zeros((IN_FEATURES, HIDDEN_PAD), jnp.float32)
    w1t = w1t.at[:, :HIDDEN].set(jnp.transpose(w1)).astype(jnp.bfloat16)
    b1p = jnp.zeros((1, HIDDEN_PAD), jnp.float32).at[0, :HIDDEN].set(b1)
    w2t = jnp.zeros((HIDDEN_PAD, OUT_FEATURES), jnp.float32)
    w2t = w2t.at[:HIDDEN, :].set(jnp.transpose(w2)).astype(jnp.bfloat16)
    b2p = b2.reshape(1, OUT_FEATURES).astype(jnp.float32)
    return w1t, b1p, w2t, b2p


def _choose_tile(B, tb):
    """Pick the batch tile.  Small batches: one full-extent block (block dims ==
    array dims is always legal).  Large batches: a 256-multiple tile giving
    >= ~4 grid steps so megacore sharding and double-buffering engage."""
    if B <= 256:
        return B
    target = -(-pl.cdiv(B, 4) // 256) * 256    # cdiv(B,4) rounded up to 256-multiple
    return max(256, min(tb, target))


def _vmem_limit_bytes(tb_eff, x_itemsize):
    """Derive the scoped VMEM limit from actual usage (+50% slack), cap at 48 MiB."""
    lane_in = -(-IN_FEATURES // 128) * 128                      # 784 -> 896 lane-padded
    x_bufs = 2 * tb_eff * lane_in * x_itemsize                  # double-buffered x tiles
    out_bufs = 2 * tb_eff * 128 * 4                             # double-buffered out tiles
    weights = 2 * 2 * (IN_FEATURES * HIDDEN_PAD + HIDDEN_PAD * 128) + 4 * 8 * 128 * 4
    interm = tb_eff * (lane_in * 2 + HIDDEN_PAD * 4 + 128 * 4)  # bf16 x temp, f32 h, f32 out
    total = x_bufs + out_bufs + weights + interm
    return min(int(total * 1.5) + (2 << 20), 48 * 1024 * 1024)


def mlp_forward(x, params, tb=DEFAULT_TB):
    """x: [..., 28, 28] (or [B, 784]) f32 or bf16; params from prepare_params.
    Returns [B, 10] f32.  bf16 x is preferred (halves the binding HBM stream)."""
    w1p, b1p, w2p, b2p = params
    x2d = x.reshape(-1, IN_FEATURES)              # == x.view(-1, 784)
    B = x2d.shape[0]
    if B == 0:                                    # guard: grid=(0,) is meaningless
        return jnp.zeros((0, OUT_FEATURES), jnp.float32)

    tb_eff = _choose_tile(B, tb)
    grid = (pl.cdiv(B, tb_eff),)                  # ragged tail handled by Pallas clamping
    x_itemsize = jnp.dtype(x2d.dtype).itemsize

    flops = 2 * B * IN_FEATURES * HIDDEN_PAD + 2 * B * HIDDEN_PAD * OUT_FEATURES
    bytes_accessed = (B * IN_FEATURES * x_itemsize
                      + B * OUT_FEATURES * 4
                      + (IN_FEATURES * HIDDEN_PAD + HIDDEN_PAD * OUT_FEATURES) * 2
                      + (HIDDEN_PAD + OUT_FEATURES) * 4)

    out = pl.pallas_call(
        mlp_kernel,
        out_shape=jax.ShapeDtypeStruct((B, OUT_FEATURES), jnp.float32),
        grid=grid,
        in_specs=[
            pl.BlockSpec((tb_eff, IN_FEATURES), lambda i: (i, 0)),       # streamed x tiles
            pl.BlockSpec((IN_FEATURES, HIDDEN_PAD), lambda i: (0, 0)),   # resident weights
            pl.BlockSpec((1, HIDDEN_PAD), lambda i: (0, 0)),             # resident bias
            pl.BlockSpec((HIDDEN_PAD, OUT_FEATURES), lambda i: (0, 0)),  # resident weights
            pl.BlockSpec((1, OUT_FEATURES), lambda i: (0, 0)),           # resident bias
        ],
        out_specs=pl.BlockSpec((tb_eff, OUT_FEATURES), lambda i: (i, 0)),
        compiler_params=pltpu.CompilerParams(
            dimension_semantics=("parallel",),                 # megacore on v7x
            vmem_limit_bytes=_vmem_limit_bytes(tb_eff, x_itemsize),
        ),
        cost_estimate=pl.CostEstimate(
            flops=flops, transcendentals=0, bytes_accessed=bytes_accessed),
    )(x2d, w1p, b1p, w2p, b2p)
    return out


if __name__ == "__main__":
    key = jax.random.PRNGKey(0)
    kx, k1, k2, k3, k4 = jax.random.split(key, 5)

    # PyTorch nn.Linear shapes: weight [out, in], bias [out].
    w1 = jax.random.normal(k1, (HIDDEN, IN_FEATURES), dtype=jnp.float32) * 0.05
    b1 = jax.random.normal(k2, (HIDDEN,), dtype=jnp.float32) * 0.05
    w2 = jax.random.normal(k3, (OUT_FEATURES, HIDDEN), dtype=jnp.float32) * 0.05
    b2 = jax.random.normal(k4, (OUT_FEATURES,), dtype=jnp.float32) * 0.05
    params = prepare_params(w1, b1, w2, b2)

    def ref_fwd(xf):
        xf = xf.reshape(-1, IN_FEATURES).astype(jnp.float32)
        return jnp.maximum(xf @ w1.T + b1, 0.0) @ w2.T + b2

    # 1) Small f32 batch (fallback path: f32 streamed, cast to bf16 in-kernel).
    B = 2
    x = jax.random.normal(kx, (B, 1, 28, 28), dtype=jnp.float32)
    out = jax.block_until_ready(mlp_forward(x, params))
    assert out.shape == (B, OUT_FEATURES)
    assert jnp.allclose(out, ref_fwd(x), atol=2e-2, rtol=2e-2), \
        float(jnp.max(jnp.abs(out - ref_fwd(x))))

    # 2) Gridded + ragged-tail path (no jnp.pad), bf16 x streamed from HBM.
    #    B2=600 with tile 256 -> 3 grid steps, last block is a partial 88 rows.
    B2 = 600
    x2 = jax.random.normal(kx, (B2, 1, 28, 28), dtype=jnp.float32).astype(jnp.bfloat16)
    out2 = jax.block_until_ready(mlp_forward(x2, params, tb=256))
    assert out2.shape == (B2, OUT_FEATURES)
    assert jnp.allclose(out2, ref_fwd(x2), atol=2e-2, rtol=2e-2), \
        float(jnp.max(jnp.abs(out2 - ref_fwd(x2))))

    print("KERNEL_OK")
</pallas_src>

<mosaic_0001>
module attributes {stable_mosaic.version = 11 : i64} {
  func.func @mlp_kernel(%arg0: i32, %arg1: memref<2x784xf32, #tpu.memory_space<vmem>>, %arg2: memref<784x128xbf16, #tpu.memory_space<vmem>>, %arg3: memref<1x128xf32, #tpu.memory_space<vmem>>, %arg4: memref<128x10xbf16, #tpu.memory_space<vmem>>, %arg5: memref<1x10xf32, #tpu.memory_space<vmem>>, %arg6: memref<2x10xf32, #tpu.memory_space<vmem>>) attributes {dimension_semantics = [#tpu.dimension_semantics<parallel>], iteration_bounds = array<i64: 1>, scalar_prefetch = 0 : i64, scratch_operands = 0 : i64, tpu.core_type = #tpu.core_type<tc>, window_params = [{transform_indices = @transform_0, window_bounds = array<i64: 2, 784>}, {pipeline_mode = #tpu.pipeline_mode<synchronous>, transform_indices = @transform_1, window_bounds = array<i64: 784, 128>}, {pipeline_mode = #tpu.pipeline_mode<synchronous>, transform_indices = @transform_2, window_bounds = array<i64: 1, 128>}, {pipeline_mode = #tpu.pipeline_mode<synchronous>, transform_indices = @transform_3, window_bounds = array<i64: 128, 10>}, {pipeline_mode = #tpu.pipeline_mode<synchronous>, transform_indices = @transform_4, window_bounds = array<i64: 1, 10>}, {transform_indices = @transform_5, window_bounds = array<i64: 2, 10>}]} {
    %c0 = arith.constant 0 : index
    %c0_0 = arith.constant 0 : index
    %0 = vector.load %arg1[%c0, %c0_0] : memref<2x784xf32, #tpu.memory_space<vmem>>, vector<2x784xf32>
    %1 = arith.truncf %0 : vector<2x784xf32> to vector<2x784xbf16>
    %c0_1 = arith.constant 0 : index
    %c0_2 = arith.constant 0 : index
    %2 = vector.load %arg2[%c0_1, %c0_2] : memref<784x128xbf16, #tpu.memory_space<vmem>>, vector<784x128xbf16>
    %cst = arith.constant dense<0.000000e+00> : vector<2x128xf32>
    %3 = tpu.matmul %1, %2, %cst {dimension_numbers = #tpu.dot_dimension_numbers<[1], [0], [0], [1], [0, 0, 1, 1], [], []>} : vector<2x784xbf16>, vector<784x128xbf16>, vector<2x128xf32> -> vector<2x128xf32>
    %c0_3 = arith.constant 0 : index
    %c0_4 = arith.constant 0 : index
    %4 = vector.load %arg3[%c0_3, %c0_4] : memref<1x128xf32, #tpu.memory_space<vmem>>, vector<1x128xf32>
    %5 = vector.broadcast %4 : vector<1x128xf32> to vector<2x128xf32>
    %6 = arith.addf %3, %5 : vector<2x128xf32>
    %cst_5 = arith.constant 0.000000e+00 : f32
    %7 = vector.broadcast %cst_5 : f32 to vector<2x128xf32>
    %8 = arith.maximumf %6, %7 : vector<2x128xf32>
    %9 = arith.truncf %8 : vector<2x128xf32> to vector<2x128xbf16>
    %c0_6 = arith.constant 0 : index
    %c0_7 = arith.constant 0 : index
    %10 = vector.load %arg4[%c0_6, %c0_7] : memref<128x10xbf16, #tpu.memory_space<vmem>>, vector<128x10xbf16>
    %cst_8 = arith.constant dense<0.000000e+00> : vector<2x10xf32>
    %11 = tpu.matmul %9, %10, %cst_8 {dimension_numbers = #tpu.dot_dimension_numbers<[1], [0], [0], [1], [0, 0, 1, 1], [], []>} : vector<2x128xbf16>, vector<128x10xbf16>, vector<2x10xf32> -> vector<2x10xf32>
    %c0_9 = arith.constant 0 : index
    %c0_10 = arith.constant 0 : index
    %12 = vector.load %arg5[%c0_9, %c0_10] : memref<1x10xf32, #tpu.memory_space<vmem>>, vector<1x10xf32>
    %13 = vector.broadcast %12 : vector<1x10xf32> to vector<2x10xf32>
    %14 = arith.addf %11, %13 : vector<2x10xf32>
    %c0_11 = arith.constant 0 : index
    %c0_12 = arith.constant 0 : index
    %15 = vector.load %arg6[%c0_11, %c0_12] : memref<2x10xf32, #tpu.memory_space<vmem>>, vector<2x10xf32>
    tpu.vector_store %arg6[%c0_11, %c0_12], %14 {strides = array<i32>} : memref<2x10xf32, #tpu.memory_space<vmem>>, vector<2x10xf32>,
    return
  }
  func.func @transform_0(%arg0: i32) -> (i32, i32) {
    %c0_i32 = arith.constant 0 : i32
    %c0_i32_0 = arith.constant 0 : i32
    return %arg0, %c0_i32 : i32, i32
  }
  func.func @transform_1(%arg0: i32) -> (i32, i32) {
    %c0_i32 = arith.constant 0 : i32
    %c0_i32_0 = arith.constant 0 : i32
    %c0_i32_1 = arith.constant 0 : i32
    return %c0_i32, %c0_i32_0 : i32, i32
  }
  func.func @transform_2(%arg0: i32) -> (i32, i32) {
    %c0_i32 = arith.constant 0 : i32
    %c0_i32_0 = arith.constant 0 : i32
    %c0_i32_1 = arith.constant 0 : i32
    return %c0_i32, %c0_i32_0 : i32, i32
  }
  func.func @transform_3(%arg0: i32) -> (i32, i32) {
    %c0_i32 = arith.constant 0 : i32
    %c0_i32_0 = arith.constant 0 : i32
    %c0_i32_1 = arith.constant 0 : i32
    return %c0_i32, %c0_i32_0 : i32, i32
  }
  func.func @transform_4(%arg0: i32) -> (i32, i32) {
    %c0_i32 = arith.constant 0 : i32
    %c0_i32_0 = arith.constant 0 : i32
    %c0_i32_1 = arith.constant 0 : i32
    return %c0_i32, %c0_i32_0 : i32, i32
  }
  func.func @transform_5(%arg0: i32) -> (i32, i32) {
    %c0_i32 = arith.constant 0 : i32
    %c0_i32_0 = arith.constant 0 : i32
    return %arg0, %c0_i32 : i32, i32
  }
}

</mosaic_0001>

<bundles_post_ra>
// kernel: tpu_custom_call.1
= control target key start
LH: loop header
LB: loop body
LE: loop exit
PB: predicated region body
PF: predicated region fallthrough
CT: control target
= control target key end

     0   :  { %10 = vsyncpa [#allocation3], 0  ;;  %s1168_s0 = inlined_call_operand.vmem [shape: f32[2,784], index: 0, kind: input, shape index: {}]   ;;  %s1169_s1 = inlined_call_operand.hbm [shape: bf16[784,128], index: 1, kind: input, shape index: {}]   ;;  %s1170_s2 = inlined_call_operand.vmem [shape: f32[1,128], index: 2, kind: input, shape index: {}]   ;;  %s1171_s3 = inlined_call_operand.vmem [shape: bf16[128,10], index: 3, kind: input, shape index: {}]   ;;  %s1172_s4 = inlined_call_operand.vmem [shape: f32[1,10], index: 4, kind: input, shape index: {}]   ;;  %s1173_s5 = inlined_call_operand.hbm [shape: f32[2,10], index: 5, kind: output, shape index: {}]  }
   0x1   :  { %11 = vsyncpa [#allocation4], 0  ;;  %s1057_s18 = smov [#allocation2]   ;;  %s1009_s22 = scalar_lea.hbm %s1169_s1, 6272 }
   0x2   :  { %s19_s19 = sshll.u32 %s1057_s18, 4  ;;  %p1010_p0 = scmp.ne.s32.totalorder %s1169_s1, %s1009_s22  ;;  %s20_s19 = int_to_ptr.vmem [resolvable:$true] %s19_s19 }
   0x3   :  { %p1013_p1 = scmp.lt.u32.totalorder %s1009_s22, %s1169_s1 }
   0x5   :  { %p1015_p2 = pnand %p1013_p1, %p1010_p0 }
   0x7   :  { %1018 = shalt.err (!%p1015_p2)
}
   0x8   :  { %s1019_s27 = scalar_lea.vmem %s20_s19, 6272  ;;  %p1024_p4 = scmp.lt.s32.totalorder %s20_s19, %s20_s19 }
   0x9   :  { %p1020_p3 = scmp.ne.s32.totalorder %s20_s19, %s1019_s27  ;;  %p1025_p5 = scmp.lt.s32.totalorder %s1019_s27, %s1019_s27 }
   0xb   :  { %p1026_p6 = por %p1025_p5, %p1024_p4 }
   0xd   :  { %p1027_p7 = pnand %p1026_p6, %p1020_p3 }
   0xf   :  { %1030 = shalt.err (!%p1027_p7)
}
  0x10   :  { %s1058_s28 = smov 64   ;;  %s1059_s29 = smov 4  }
  0x11   :  { %25 = dma.hbm_to_vmem [thread:$0]  %s1169_s1, 6272, %s20_s19, [#allocation3], %s1058_s28, %s1058_s28, %s1059_s29  }
  0x12   :  { %1053 = dma.done.wait [#allocation3], 6272  }
  0x13   :  { %1054 = vsyncadd [#allocation3], 4294961024  ;;  %v950_v0 = vld [vmem:[#allocation2 + $0x40] sm:$0xff]   ;;  %v954_v4 = vld [vmem:[#allocation2 + $0x48] sm:$0xff]   ;;  %v1060_v21 = vmov 1983009808   ;;  %v44_v23 = vlaneseq }
  0x14   :  { %v951_v1 = vld [vmem:[#allocation2] sm:$0xff]   ;;  %840 = vmatprep.subr.bf16.mxu0 %v950_v0  ;;  %v955_v5 = vld [vmem:[#allocation2 + $0x8] sm:$0xff]   ;;  %v958_v8 = vld [vmem:[#allocation2 + $0x50] sm:$0xff]   ;;  %v42_v22 = vunpack.c.l.s4 %v1060_v21  ;;  %v1061_v45 = vmov 0.0   ;;  %vm1062_vm0 = vmmov 0   ;;  %vm486_vm1 = vcmask 130048  }
  0x15   :  { %v952_v2 = vld [vmem:[#allocation2 + $0xc0] sm:$0xff]   ;;  %841 = vmatpush3.bf16.msra.mxu0 %v951_v1  ;;  %v956_v6 = vld [vmem:[#allocation2 + $0xc8] sm:$0xff]   ;;  %v959_v9 = vld [vmem:[#allocation2 + $0x10] sm:$0xff]   ;;  %v45_v29 = vshrl.u32 %v44_v23, 7  ;;  %s1063_s27 = smov [#allocation5]   ;;  %vm763_vm2 = vcmask 74752  }
  0x16   :  { %v953_v3 = vld [vmem:[#allocation2 + $0x80] sm:$0xff]   ;;  %862 = vmatprep.subr.bf16.mxu1 %v952_v2  ;;  %842 = vmatprep.subr.bf16.mxu0 %v954_v4  ;;  %v957_v7 = vld [vmem:[#allocation2 + $0x88] sm:$0xff]   ;;  %v960_v10 = vld [vmem:[#allocation2 + $0xd0] sm:$0xff]   ;;  %v43_v28 = vunpack.c.0.s8 %v42_v22  ;;  %s771_s28 = sshll.u32 %s1063_s27, 4  ;;  %s772_s28 = int_to_ptr.vmem [resolvable:$true] %s771_s28 }
  0x17   :  { %863 = vmatpush3.bf16.msra.mxu1 %v953_v3  ;;  %v961_v11 = vld [vmem:[#allocation2 + $0x90] sm:$0xff]   ;;  %v962_v12 = vld [vmem:[#allocation2 + $0x58] sm:$0xff]   ;;  %v966_v16 = vld [vmem:[#allocation2 + $0x60] sm:$0xff]   ;;  %s1031_s29 = scalar_lea.vmem %s772_s28, 32  ;;  %p1036_p9 = scmp.lt.s32.totalorder %s772_s28, %s772_s28 }
  0x18   :  { %864 = vmatprep.subr.bf16.mxu1 %v956_v6  ;;  %v963_v13 = vld [vmem:[#allocation2 + $0x18] sm:$0xff]   ;;  %v967_v17 = vld [vmem:[#allocation2 + $0x20] sm:$0xff]   ;;  %v970_v20 = vld [vmem:[#allocation2 + $0x68] sm:$0xff]   ;;  %v46_v34 = vsub.s32 %v43_v28, %v45_v29  ;;  %p1032_p8 = scmp.ne.s32.totalorder %s772_s28, %s1031_s29  ;;  %p1037_p10 = scmp.lt.s32.totalorder %s1031_s29, %s1031_s29 }
  0x19   :  { %843 = vmatpush3.bf16.msra.mxu0 %v955_v5  ;;  %v964_v14 = vld [vmem:[#allocation2 + $0xd8] sm:$0xff]   ;;  %v968_v18 = vld [vmem:[#allocation2 + $0xe0] sm:$0xff]   ;;  %v971_v24 = vld [vmem:[#allocation2 + $0x28] sm:$0xff]  }
  0x1a   :  { %844 = vmatprep.subr.bf16.mxu0 %v958_v8  ;;  %v965_v15 = vld [vmem:[#allocation2 + $0x98] sm:$0xff]   ;;  %v969_v19 = vld [vmem:[#allocation2 + $0xa0] sm:$0xff]   ;;  %v972_v25 = vld [vmem:[#allocation2 + $0xe8] sm:$0xff]   ;;  %p1038_p11 = por %p1037_p10, %p1036_p9 }
  0x1b   :  { %865 = vmatpush3.bf16.msra.mxu1 %v957_v7  ;;  %v973_v26 = vld [vmem:[#allocation2 + $0xa8] sm:$0xff]   ;;  %v974_v27 = vld [vmem:[#allocation2 + $0x70] sm:$0xff]   ;;  %v978_v33 = vld [vmem:[#allocation2 + $0x78] sm:$0xff]  }
  0x1c   :  { %866 = vmatprep.subr.bf16.mxu1 %v960_v10  ;;  %v975_v30 = vld [vmem:[#allocation2 + $0x30] sm:$0xff]   ;;  %v979_v35 = vld [vmem:[#allocation2 + $0x38] sm:$0xff]   ;;  %v36_v37 = vld [vmem:[%s1168_s0] sm:$0xff]  ;;  %p1039_p12 = pnand %p1038_p11, %p1032_p8 }
  0x1d   :  { %845 = vmatpush3.bf16.msra.mxu0 %v959_v9  ;;  %v976_v31 = vld [vmem:[#allocation2 + $0xf0] sm:$0xff]   ;;  %v980_v36 = vld [vmem:[#allocation2 + $0xf8] sm:$0xff]   ;;  %v47_v38 = vrot.slane %v36_v37, %v46_v34  ;;  %v40_v40 = vcombine.high %v36_v37, %v36_v37  ;;  %v982_v41 = vld [vmem:[#allocation2 + $0x140] sm:$0xff]  }
  0x1e   :  { %846 = vmatprep.subr.bf16.mxu0 %v962_v12  ;;  %v977_v32 = vld [vmem:[#allocation2 + $0xb0] sm:$0xff]   ;;  %v981_v39 = vld [vmem:[#allocation2 + $0xb8] sm:$0xff]   ;;  %v984_v48 = vld [vmem:[#allocation2 + $0x100] sm:$0xff]  }
  0x1f   :  { %867 = vmatpush3.bf16.msra.mxu1 %v961_v11  ;;  %v55_v42 = vcombine.high %v47_v38, %v47_v38  ;;  %v54_v43 = vrot.slane %v40_v40, %v46_v34  ;;  %v80_v44 = vpack.c.bf16 %v47_v38, %v47_v38  ;;  %v985_v50 = vld [vmem:[#allocation2 + $0x148] sm:$0xff]   ;;  %v987_v53 = vld [vmem:[#allocation2 + $0x150] sm:$0xff]   ;;  %v989_v55 = vld [vmem:[#allocation2 + $0x158] sm:$0xff]  }
  0x20   :  { %868 = vmatprep.subr.bf16.mxu1 %v964_v14  ;;  %v986_v52 = vld [vmem:[#allocation2 + $0x108] sm:$0xff]   ;;  %v988_v54 = vld [vmem:[#allocation2 + $0x110] sm:$0xff]   ;;  %v990_v56 = vld [vmem:[#allocation2 + $0x118] sm:$0xff]  }
  0x21   :  { %847 = vmatpush3.bf16.msra.mxu0 %v963_v13  ;;  %v81_v46 = vpack.c.bf16 %v55_v42, %v55_v42  ;;  %v56_v47 = vcombine.high %v54_v43, %v54_v43  ;;  %v82_v49 = vpack.c.bf16 %v54_v43, %v54_v43  ;;  %v991_v57 = vld [vmem:[#allocation2 + $0x160] sm:$0xff]   ;;  %v37_v59 = vld [vmem:[%s1168_s0 + $0x8] sm:$0x3f]  ;;  %v995_v5 = vld [vmem:[#allocation2 + $0x170] sm:$0xff]  }
  0x22   :  { %848 = vmatprep.subr.bf16.mxu0 %v966_v16  ;;  %v999_v58 = vld [vmem:[#allocation2 + $0x180] sm:$0xff]   ;;  %v57_v61 = vcombine.high %v37_v59, %v37_v59  ;;  %v64_v62 = vrot.slane %v37_v59, %v46_v34  ;;  %v993_v63 = vld [vmem:[#allocation2 + $0x168] sm:$0xff]   ;;  %v996_v6 = vld [vmem:[#allocation2 + $0x130] sm:$0xff]  }
  0x23   :  { %869 = vmatpush3.bf16.msra.mxu1 %v965_v15  ;;  %522 = vmatprep.mubr.bf16.mxu0 %v81_v46  ;;  %v83_v51 = vpack.c.bf16 %v56_v47, %v56_v47  ;;  %v992_v60 = vld [vmem:[#allocation2 + $0x120] sm:$0xff]   ;;  %v994_v4 = vld [vmem:[#allocation2 + $0x128] sm:$0xff]   ;;  %v997_v7 = vld [vmem:[#allocation2 + $0x178] sm:$0xff]  }
  0x24   :  { %870 = vmatprep.subr.bf16.mxu1 %v968_v18  ;;  %v71_v0 = vrot.slane %v57_v61, %v46_v34  ;;  %v72_v1 = vcombine.high %v64_v62, %v64_v62  ;;  %v998_v8 = vld [vmem:[#allocation2 + $0x138] sm:$0xff]   ;;  %v84_v9 = vpack.c.bf16 %v64_v62, %v64_v62  ;;  %v1001_v10 = vld [vmem:[%s1171_s3] sm:$0xff]   ;;  %v1002_v11 = vld [vmem:[%s1171_s3 + $0x8] sm:$0xff]  }
  0x25   :  { %849 = vmatpush3.bf16.msra.mxu0 %v967_v17  ;;  %562 = vmatprep.mubr.bf16.mxu1 %v83_v51  ;;  %v1003_v12 = vld [vmem:[%s1171_s3 + $0x10] sm:$0xff]   ;;  %v1004_v13 = vld [vmem:[%s1171_s3 + $0x18] sm:$0xff]   ;;  %v1005_v14 = vld [vmem:[%s1171_s3 + $0x20] sm:$0xff]  }
  0x26   :  { %850 = vmatprep.subr.bf16.mxu0 %v970_v20  ;;  %v85_v2 = vpack.c.bf16 %v72_v1, %v72_v1  ;;  %v86_v3 = vpack.c.bf16 %v71_v0, %v71_v0  ;;  %v1006_v15 = vld [vmem:[%s1171_s3 + $0x28] sm:$0xff]   ;;  %v1007_v16 = vld [vmem:[%s1171_s3 + $0x30] sm:$0xff]   ;;  %v1008_v17 = vld [vmem:[%s1171_s3 + $0x38] sm:$0xff]  }
  0x27   :  { %871 = vmatpush3.bf16.msra.mxu1 %v969_v19  ;;  %v780_v19 = vld [vmem:[%s1170_s2] ss:$0 sm:$0xff] }
  0x28   :  { %872 = vmatprep.subr.bf16.mxu1 %v972_v25 }
  0x29   :  { %851 = vmatpush3.bf16.msra.mxu0 %v971_v24 }
  0x2a   :  { %852 = vmatprep.subr.bf16.mxu0 %v974_v27 }
  0x2b   :  { %873 = vmatpush3.bf16.msra.mxu1 %v973_v26 }
  0x2c   :  { %874 = vmatprep.subr.bf16.mxu1 %v976_v31 }
  0x2d   :  { %853 = vmatpush3.bf16.msra.mxu0 %v975_v30 }
  0x2e   :  { %854 = vmatprep.subr.bf16.mxu0 %v978_v33 }
  0x2f   :  { %875 = vmatpush3.bf16.msra.mxu1 %v977_v32 }
  0x30   :  { %876 = vmatprep.subr.bf16.mxu1 %v980_v36 }
  0x31   :  { %855 = vmatpush3.bf16.msra.mxu0 %v979_v35 }
  0x32   :  { %884 = vmatprep.subr.bf16.mxu0 %v982_v41 }
  0x33   :  { %877 = vmatpush3.bf16.msra.mxu1 %v981_v39 }
  0x34   :  { %917 = vmatprep.subr.bf16.mxu1 %v1061_v45  ;;  %523 = vmatmul.mubr.bf16.vlgmr.msra.gmra.mrb[0].mxu0 %v80_v44  ;;  %v831_v44 = vld [vmem:[%s1172_s4] ss:$0 sm:$0xff] }
  0x35   :  { %885 = vmatpush3.bf16.msra.mxu0 %v984_v48  ;;  %602 = vmatprep.mubr.bf16.mxu0 %v85_v2 }
  0x36   :  { %563 = vmatmul.mubr.bf16.vlgmr.msra.gmra.mrb[0].mxu1 %v82_v49  ;;  %886 = vmatprep.subr.bf16.mxu0 %v985_v50 }
  0x37   :  { %919 = vmatprep.mubr.msk.bf16.mxu1 %vm1062_vm0, %v1061_v45  ;;  %918 = vmatpush3.bf16.msra.mxu1 %v999_v58 }
  0x38   :  { %923 = vmatprep.subr.bf16.mxu1 %v1061_v45 }
  0x39   :  { %887 = vmatpush3.bf16.msra.mxu0 %v986_v52 }
  0x3a   :  { %888 = vmatprep.subr.bf16.mxu0 %v987_v53 }
  0x3d   :  { %889 = vmatpush3.bf16.msra.mxu0 %v988_v54 }
  0x3e   :  { %890 = vmatprep.subr.bf16.mxu0 %v989_v55  ;;  %920 = vmatmul.mubr.msk.bf16.vlgmr.msra.gmra.mrb[4].mxu1 %vm486_vm1, %v86_v3 }
  0x3f   :  { %939 = vmatprep.mubr.msk.bf16.mxu1 %vm1062_vm0, %v1061_v45  ;;  %924 = vmatpush3.bf16.msra.mxu1 %v1001_v10 }
  0x40   :  { %925 = vmatprep.subr.bf16.mxu1 %v1061_v45 }
  0x41   :  { %891 = vmatpush3.bf16.msra.mxu0 %v990_v56 }
  0x42   :  { %892 = vmatprep.subr.bf16.mxu0 %v991_v57 }
  0x43   :  { %926 = vmatpush3.bf16.msra.mxu1 %v1002_v11 }
  0x44   :  { %927 = vmatprep.subr.bf16.mxu1 %v1061_v45 }
  0x45   :  { %893 = vmatpush3.bf16.msra.mxu0 %v992_v60 }
  0x46   :  { %894 = vmatprep.subr.bf16.mxu0 %v993_v63 }
  0x47   :  { %928 = vmatpush3.bf16.msra.mxu1 %v1003_v12 }
  0x48   :  { %929 = vmatprep.subr.bf16.mxu1 %v1061_v45 }
  0x49   :  { %895 = vmatpush3.bf16.msra.mxu0 %v994_v4 }
  0x4a   :  { %896 = vmatprep.subr.bf16.mxu0 %v995_v5 }
  0x4b   :  { %930 = vmatpush3.bf16.msra.mxu1 %v1004_v13 }
  0x4c   :  { %931 = vmatprep.subr.bf16.mxu1 %v1061_v45 }
  0x4d   :  { %897 = vmatpush3.bf16.msra.mxu0 %v996_v6 }
  0x4e   :  { %898 = vmatprep.subr.bf16.mxu0 %v997_v7 }
  0x4f   :  { %932 = vmatpush3.bf16.msra.mxu1 %v1005_v14 }
  0x50   :  { %933 = vmatprep.subr.bf16.mxu1 %v1061_v45 }
  0x51   :  { %899 = vmatpush3.bf16.msra.mxu0 %v998_v8 }
  0x53   :  { %934 = vmatpush3.bf16.msra.mxu1 %v1006_v15 }
  0x54   :  { %603 = vmatmul.mubr.bf16.vlgmr.msra.gmra.mrb[4].mxu0 %v84_v9  ;;  %935 = vmatprep.subr.bf16.mxu1 %v1061_v45 }
  0x57   :  { %936 = vmatpush3.bf16.msra.mxu1 %v1007_v16 }
  0x58   :  { %937 = vmatprep.subr.bf16.mxu1 %v1061_v45 }
  0x5b   :  { %938 = vmatpush3.bf16.msra.mxu1 %v1008_v17 }
 0x107   :  { %v856_v18 = vpop.f32.mrb[0].mxu0 }
 0x108   :  { %v857_v20 = vpop.f32.mrb[1].mxu0 }
 0x109   :  { %v858_v21 = vadd.f32 %v857_v20, %v856_v18  ;;  %v859_v22 = vpop.f32.mrb[2].mxu0  ;;  %v878_v23 = vpop.f32.mrb[0].mxu1 }
 0x10a   :  { %v860_v24 = vpop.f32.mrb[3].mxu0  ;;  %v879_v25 = vpop.f32.mrb[1].mxu1 }
 0x10b   :  { %v525_v26 = vadd.f32 %v858_v21, %v780_v19  ;;  %v880_v27 = vadd.f32 %v879_v25, %v878_v23  ;;  %v881_v28 = vpop.f32.mrb[2].mxu1 }
 0x10c   :  { %v882_v29 = vpop.f32.mrb[3].mxu1 }
 0x10d   :  { %v565_v30 = vadd.f32 %v880_v27, %v525_v26 }
 0x111   :  { %v644_v31 = vpop.f32.mrb[4].mxu1 }
 0x112   :  { %v921_v32 = vpop.f32.mrb[5].mxu1 }
 0x113   :  { %v647_v33 = vpop.f32.mrb[6].mxu1 }
 0x114   :  { %v922_v34 = vpop.f32.mrb[7].mxu1 }
 0x127   :  { %v900_v35 = vpop.f32.mrb[4].mxu0 }
 0x128   :  { %v901_v36 = vpop.f32.mrb[5].mxu0 }
 0x129   :  { %v902_v37 = vadd.f32 %v901_v36, %v900_v35  ;;  %v903_v38 = vpop.f32.mrb[6].mxu0 }
 0x12a   :  { %v904_v39 = vpop.f32.mrb[7].mxu0 }
 0x12b   :  { %v605_v40 = vadd.f32 %v902_v37, %v565_v30 }
 0x12d   :  { %v645_v41 = vadd.f32 %v644_v31, %v605_v40 }
 0x12f   :  { %v650_v42 = vmax.f32 %v645_v41, 0.0 }
 0x131   :  { %v651_v43 = vpack.c.bf16 %v650_v42, %v650_v42 }
 0x133   :  { %940 = vmatmul.mubr.bf16.vlgmr.msra.gmra.mrb[8].mxu1 %v651_v43 }
 0x206   :  { %v757_v45 = vpop.f32.mrb[8].mxu1 }
 0x207   :  { %v758_v46 = vadd.f32 %v831_v44, %v757_v45  ;;  %v941_v47 = vpop.f32.mrb[9].mxu1 }
 0x208   :  { %v760_v48 = vpop.f32.mrb[10].mxu1 }
 0x209   :  { %v942_v49 = vpop.f32.mrb[11].mxu1  ;;  %764 = vst.msk [vmem:[#allocation5] sm:$0x3] %vm763_vm2, %v758_v46 }
 0x20a   :  { %1042 = shalt.err (!%p1039_p12)
}
 0x20b   :  { %s1043_s4 = scalar_lea.hbm %s1173_s5, 32 }
 0x20c   :  { %p1044_p13 = scmp.ne.s32.totalorder %s1173_s5, %s1043_s4  ;;  %p1047_p0 = scmp.lt.u32.totalorder %s1043_s4, %s1173_s5 }
 0x20e   :  { %p1049_p1 = pnand %p1047_p0, %p1044_p13 }
 0x210   :  { %1052 = shalt.err (!%p1049_p1)
}
 0x211   :  { %774 = dma.vmem_to_hbm [thread:$0]  %s772_s28, 32, %s1173_s5, [#allocation4]  }
 0x212   :  { %1055 = dma.done.wait [#allocation4], 32  }
 0x213   :  { %1056 = vsyncadd [#allocation4], 4294967264 }
 0x214   :  { %778 = vsyncpa [#allocation3], 1 }
 0x215   :  { %779 = vsyncpa [#allocation4], 1 }

</bundles_post_ra>
